<compile_context>
chip_gen: v7x
topology: tpu7x:2x2x1
jax: 0.10.0
libtpu: 0.0.40
codegen_flags: <defaults>
</compile_context>

<pallas_src>
import functools
import math

import jax
import jax.numpy as jnp
from jax.experimental import pallas as pl
from jax.experimental.pallas import tpu as pltpu


def _round_up(x, m):
    return (x + m - 1) // m * m


def _rff_kernel(x_ref, lam_ref, b_ref, o_ref, *, scale):
    # (TILE_M, K) @ (K, F) on the MXU with f32 accumulation.
    acc = jnp.dot(x_ref[...], lam_ref[...], preferred_element_type=jnp.float32)
    # Phase shift + cosine (EUP) + static scale (VPU).
    o_ref[...] = (scale * jnp.cos(acc + b_ref[...])).astype(o_ref.dtype)


def rff_forward(emb, lambdas, bias, *, tile_m=512):
    """emb: (N, dim), lambdas: (dim, fdim), bias: (fdim,) -> (N, fdim)."""
    n, dim = emb.shape
    fdim = lambdas.shape[1]
    scale = math.sqrt(2.0) / math.sqrt(dim)  # norm * sqrt(2)

    # Lane-dense padding for the K (contraction) and output feature dims.
    k_pad = _round_up(dim, 128)
    f_pad = _round_up(fdim, 128)

    # Row tile: big for large N (amortizes per-step overhead, feeds the MXU),
    # shrunk for tiny demos; always a multiple of 8 (sublane constraint).
    tm = max(8, min(tile_m, _round_up(n, 8)))
    n_pad = _round_up(n, tm)

    x = jnp.zeros((n_pad, k_pad), emb.dtype).at[:n, :dim].set(emb)
    lam = jnp.zeros((k_pad, f_pad), lambdas.dtype).at[:dim, :fdim].set(lambdas)
    b = jnp.zeros((1, f_pad), bias.dtype).at[0, :fdim].set(bias)

    cost = pl.CostEstimate(
        flops=2 * n_pad * k_pad * f_pad,
        transcendentals=n_pad * f_pad,
        bytes_accessed=4 * (n_pad * k_pad + k_pad * f_pad + f_pad + n_pad * f_pad),
    )

    out = pl.pallas_call(
        functools.partial(_rff_kernel, scale=scale),
        out_shape=jax.ShapeDtypeStruct((n_pad, f_pad), emb.dtype),
        grid_spec=pltpu.PrefetchScalarGridSpec(
            num_scalar_prefetch=0,
            grid=(n_pad // tm,),
            in_specs=[
                pl.BlockSpec((tm, k_pad), lambda i: (i, 0)),        # streamed rows
                pl.BlockSpec((k_pad, f_pad), lambda i: (0, 0)),     # resident in VMEM
                pl.BlockSpec((1, f_pad), lambda i: (0, 0)),         # resident in VMEM
            ],
            out_specs=pl.BlockSpec((tm, f_pad), lambda i: (i, 0)),
        ),
        compiler_params=pltpu.CompilerParams(
            dimension_semantics=("parallel",),  # megacore-shardable on v7x
        ),
        cost_estimate=cost,
    )(x, lam, b)

    return out[:n, :fdim]


def init_rff_params(key, size, dim, hyla_fdim, scale=0.1, dtype=jnp.float32):
    """Deterministic init mimicking the PyTorch module's constructor."""
    k_e, k_l, k_b = jax.random.split(key, 3)
    emb = jax.random.uniform(k_e, (size, dim), dtype, minval=-1e-5, maxval=1e-5)
    lambdas = (scale * jax.random.normal(k_l, (dim, hyla_fdim))).astype(dtype)
    bias = jax.random.uniform(k_b, (hyla_fdim,), dtype, minval=0.0,
                              maxval=2.0 * math.pi)
    return emb, lambdas, bias


if __name__ == "__main__":
    key = jax.random.PRNGKey(0)

    # Small shapes consistent with the module: size=64 nodes, dim=32 embedding,
    # HyLa_fdim=48 random features (non-multiples of 128 to exercise padding).
    size, dim, hyla_fdim = 64, 32, 48
    emb, lambdas, bias = init_rff_params(key, size, dim, hyla_fdim, scale=0.1)

    out = rff_forward(emb, lambdas, bias)
    jax.block_until_ready(out)

    # Plain-JAX reference of the RFF forward.
    norm = 1.0 / math.sqrt(dim)
    ref = norm * math.sqrt(2.0) * jnp.cos(emb @ lambdas + bias)
    assert out.shape == (size, hyla_fdim)
    assert jnp.allclose(out, ref, atol=1e-5, rtol=1e-5)

    print("KERNEL_OK")
</pallas_src>

<mosaic_0001>
module attributes {stable_mosaic.version = 11 : i64} {
  func.func @_rff_kernel(%arg0: i32, %arg1: memref<64x128xf32, #tpu.memory_space<vmem>>, %arg2: memref<128x128xf32, #tpu.memory_space<vmem>>, %arg3: memref<1x128xf32, #tpu.memory_space<vmem>>, %arg4: memref<64x128xf32, #tpu.memory_space<vmem>>) attributes {dimension_semantics = [#tpu.dimension_semantics<parallel>], iteration_bounds = array<i64: 1>, scalar_prefetch = 0 : i64, scratch_operands = 0 : i64, tpu.core_type = #tpu.core_type<tc>, window_params = [{transform_indices = @transform_0, window_bounds = array<i64: 64, 128>}, {pipeline_mode = #tpu.pipeline_mode<synchronous>, transform_indices = @transform_1, window_bounds = array<i64: 128, 128>}, {pipeline_mode = #tpu.pipeline_mode<synchronous>, transform_indices = @transform_2, window_bounds = array<i64: 1, 128>}, {transform_indices = @transform_3, window_bounds = array<i64: 64, 128>}]} {
    %c0 = arith.constant 0 : index
    %c0_0 = arith.constant 0 : index
    %0 = vector.load %arg1[%c0, %c0_0] : memref<64x128xf32, #tpu.memory_space<vmem>>, vector<64x128xf32>
    %c0_1 = arith.constant 0 : index
    %c0_2 = arith.constant 0 : index
    %1 = vector.load %arg2[%c0_1, %c0_2] : memref<128x128xf32, #tpu.memory_space<vmem>>, vector<128x128xf32>
    %cst = arith.constant dense<0.000000e+00> : vector<64x128xf32>
    %2 = tpu.matmul %0, %1, %cst {dimension_numbers = #tpu.dot_dimension_numbers<[1], [0], [0], [1], [0, 0, 1, 1], [], []>} : vector<64x128xf32>, vector<128x128xf32>, vector<64x128xf32> -> vector<64x128xf32>
    %c0_3 = arith.constant 0 : index
    %c0_4 = arith.constant 0 : index
    %3 = vector.load %arg3[%c0_3, %c0_4] : memref<1x128xf32, #tpu.memory_space<vmem>>, vector<1x128xf32>
    %4 = vector.broadcast %3 : vector<1x128xf32> to vector<64x128xf32>
    %5 = arith.addf %2, %4 : vector<64x128xf32>
    %6 = math.cos %5 : vector<64x128xf32>
    %cst_5 = arith.constant 2.500000e-01 : f32
    %7 = vector.broadcast %cst_5 : f32 to vector<64x128xf32>
    %8 = arith.mulf %7, %6 : vector<64x128xf32>
    %c0_6 = arith.constant 0 : index
    %c0_7 = arith.constant 0 : index
    %9 = vector.load %arg4[%c0_6, %c0_7] : memref<64x128xf32, #tpu.memory_space<vmem>>, vector<64x128xf32>
    tpu.vector_store %arg4[%c0_6, %c0_7], %8 {strides = array<i32>} : memref<64x128xf32, #tpu.memory_space<vmem>>, vector<64x128xf32>,
    return
  }
  func.func @transform_0(%arg0: i32) -> (i32, i32) {
    %c0_i32 = arith.constant 0 : i32
    %c0_i32_0 = arith.constant 0 : i32
    return %arg0, %c0_i32 : i32, i32
  }
  func.func @transform_1(%arg0: i32) -> (i32, i32) {
    %c0_i32 = arith.constant 0 : i32
    %c0_i32_0 = arith.constant 0 : i32
    %c0_i32_1 = arith.constant 0 : i32
    return %c0_i32, %c0_i32_0 : i32, i32
  }
  func.func @transform_2(%arg0: i32) -> (i32, i32) {
    %c0_i32 = arith.constant 0 : i32
    %c0_i32_0 = arith.constant 0 : i32
    %c0_i32_1 = arith.constant 0 : i32
    return %c0_i32, %c0_i32_0 : i32, i32
  }
  func.func @transform_3(%arg0: i32) -> (i32, i32) {
    %c0_i32 = arith.constant 0 : i32
    %c0_i32_0 = arith.constant 0 : i32
    return %arg0, %c0_i32 : i32, i32
  }
}

</mosaic_0001>

<bundles_post_ra>
// kernel: tpu_custom_call.1
= control target key start
LH: loop header
LB: loop body
LE: loop exit
PB: predicated region body
PF: predicated region fallthrough
CT: control target
= control target key end

     0   :  { %8 = vsyncpa [#allocation3], 0  ;;  %s1987_s0 = inlined_call_operand.hbm [shape: f32[64,128], index: 0, kind: input, shape index: {}]   ;;  %s1988_s1 = inlined_call_operand.hbm [shape: f32[128,128], index: 1, kind: input, shape index: {}]   ;;  %s1989_s2 = inlined_call_operand.vmem [shape: f32[1,128], index: 2, kind: input, shape index: {}]   ;;  %s1990_s3 = inlined_call_operand.hbm [shape: f32[64,128], index: 3, kind: output, shape index: {}]  }
   0x1   :  { %9 = vsyncpa [#allocation6], 0 }
   0x2   :  { %10 = vsyncpa [#allocation4], 0  ;;  %s1334_s12 = smov [#allocation2]   ;;  %s1262_s16 = scalar_lea.hbm %s1987_s0, 1024 }
   0x3   :  { %s16_s13 = sshll.u32 %s1334_s12, 4  ;;  %p1263_p0 = scmp.ne.s32.totalorder %s1987_s0, %s1262_s16  ;;  %s17_s13 = int_to_ptr.vmem [resolvable:$true] %s16_s13 }
   0x4   :  { %p1266_p1 = scmp.lt.u32.totalorder %s1262_s16, %s1987_s0 }
   0x6   :  { %p1268_p2 = pnand %p1266_p1, %p1263_p0 }
   0x8   :  { %1271 = shalt.err (!%p1268_p2)
}
   0x9   :  { %s1272_s21 = scalar_lea.vmem %s17_s13, 1024  ;;  %p1277_p4 = scmp.lt.s32.totalorder %s17_s13, %s17_s13 }
   0xa   :  { %p1273_p3 = scmp.ne.s32.totalorder %s17_s13, %s1272_s21  ;;  %p1278_p5 = scmp.lt.s32.totalorder %s1272_s21, %s1272_s21 }
   0xc   :  { %p1279_p6 = por %p1278_p5, %p1277_p4 }
   0xe   :  { %p1280_p7 = pnand %p1279_p6, %p1273_p3 }
  0x10   :  { %1283 = shalt.err (!%p1280_p7)
}
  0x11   :  { %s1335_s22 = smov 128   ;;  %s1336_s23 = smov 8  }
  0x12   :  { %22 = dma.hbm_to_vmem [thread:$0]  %s1987_s0, 1024, %s17_s13, [#allocation3], %s1335_s22, %s1335_s22, %s1336_s23  }
  0x13   :  { %s1337_s26 = smov [#allocation5]   ;;  %s1284_s30 = scalar_lea.hbm %s1988_s1, 2048 }
  0x14   :  { %s28_s27 = sshll.u32 %s1337_s26, 4  ;;  %p1285_p8 = scmp.ne.s32.totalorder %s1988_s1, %s1284_s30  ;;  %s29_s27 = int_to_ptr.vmem [resolvable:$true] %s28_s27 }
  0x15   :  { %p1288_p9 = scmp.lt.u32.totalorder %s1284_s30, %s1988_s1 }
  0x17   :  { %p1290_p10 = pnand %p1288_p9, %p1285_p8 }
  0x19   :  { %1293 = shalt.err (!%p1290_p10)
}
  0x1a   :  { %s1294_s8 = scalar_lea.vmem %s29_s27, 2048  ;;  %p1299_p12 = scmp.lt.s32.totalorder %s29_s27, %s29_s27 }
  0x1b   :  { %p1295_p11 = scmp.ne.s32.totalorder %s29_s27, %s1294_s8  ;;  %p1300_p13 = scmp.lt.s32.totalorder %s1294_s8, %s1294_s8 }
  0x1d   :  { %p1301_p0 = por %p1300_p13, %p1299_p12 }
  0x1f   :  { %p1302_p1 = pnand %p1301_p0, %p1295_p11 }
  0x21   :  { %1305 = shalt.err (!%p1302_p1)
}
  0x22   :  { %34 = dma.hbm_to_vmem [thread:$0]  %s1988_s1, 2048, %s29_s27, [#allocation6], %s1335_s22, %s1335_s22, %s1336_s23  }
  0x23   :  { %1328 = dma.done.wait [#allocation3], 1024  }
  0x24   :  { %1329 = vsyncadd [#allocation3], 4294966272 }
  0x25   :  { %1330 = dma.done.wait [#allocation6], 2048  }
  0x26   :  { %1331 = vsyncadd [#allocation6], 4294965248  ;;  %v51_v0 = vld [vmem:[#allocation5] sm:$0xff]  ;;  %v52_v1 = vld [vmem:[#allocation5 + $0x8] sm:$0xff] }
  0x27   :  { %v53_v2 = vld [vmem:[#allocation5 + $0x10] sm:$0xff]  ;;  %v1138_v3 = vpack.c.bf16 %v52_v1, %v51_v0  ;;  %v54_v4 = vld [vmem:[#allocation5 + $0x18] sm:$0xff]  ;;  %v55_v6 = vld [vmem:[#allocation5 + $0x20] sm:$0xff] }
  0x28   :  { %v1142_v5 = vpack.c.bf16 %v54_v4, %v53_v2  ;;  %v56_v7 = vld [vmem:[#allocation5 + $0x28] sm:$0xff]  ;;  %v43_v9 = vld [vmem:[#allocation2] sm:$0xff]  ;;  %v57_v11 = vld [vmem:[#allocation5 + $0x30] sm:$0xff] }
  0x29   :  { %1139 = vmatprep.subr.bf16.mxu0 %v1138_v3  ;;  %1170 = vmatprep.subr.bf16.mxu1 %v1138_v3  ;;  %v1146_v8 = vpack.c.bf16 %v56_v7, %v55_v6  ;;  %v47_v10 = vld [vmem:[#allocation2 + $0x20] sm:$0xff]  ;;  %v58_v12 = vld [vmem:[#allocation5 + $0x38] sm:$0xff]  ;;  %v60_v15 = vld [vmem:[#allocation5 + $0x48] sm:$0xff] }
  0x2a   :  { %1141 = vmatpush3.bf16.msra.mxu0 %v1138_v3  ;;  %1178 = vmatpush3.bf16.msra.mxu1 %v1138_v3  ;;  %v1150_v13 = vpack.c.bf16 %v58_v12, %v57_v11  ;;  %v59_v14 = vld [vmem:[#allocation5 + $0x40] sm:$0xff]  ;;  %v61_v17 = vld [vmem:[#allocation5 + $0x50] sm:$0xff]  ;;  %v62_v18 = vld [vmem:[#allocation5 + $0x58] sm:$0xff]  ;;  %v1339_v12 = vmov 2475754826  }
  0x2b   :  { %1143 = vmatprep.subr.bf16.mxu0 %v1142_v5  ;;  %1171 = vmatprep.subr.bf16.mxu1 %v1142_v5  ;;  %v1154_v16 = vpack.c.bf16 %v60_v15, %v59_v14  ;;  %v1158_v19 = vpack.c.bf16 %v62_v18, %v61_v17  ;;  %v63_v20 = vld [vmem:[#allocation5 + $0x60] sm:$0xff]  ;;  %v64_v21 = vld [vmem:[#allocation5 + $0x68] sm:$0xff]  ;;  %v65_v23 = vld [vmem:[#allocation5 + $0x70] sm:$0xff]  ;;  %v1340_v14 = vmov 2131351028  }
  0x2c   :  { %1126 = vmatprep.mubr.f32.mxu0 %v43_v9  ;;  %1132 = vmatprep.mubr.f32.mxu1 %v47_v10  ;;  %v1162_v22 = vpack.c.bf16 %v64_v21, %v63_v20  ;;  %v66_v24 = vld [vmem:[#allocation5 + $0x78] sm:$0xff]  ;;  %v44_v26 = vld [vmem:[#allocation2 + $0x8] sm:$0xff]  ;;  %v45_v28 = vld [vmem:[#allocation2 + $0x10] sm:$0xff]  ;;  %v1342_v18 = vmov 920167782  }
  0x2d   :  { %v1166_v25 = vpack.c.bf16 %v66_v24, %v65_v23  ;;  %v48_v27 = vld [vmem:[#allocation2 + $0x28] sm:$0xff]  ;;  %v49_v29 = vld [vmem:[#allocation2 + $0x30] sm:$0xff]  ;;  %v46_v30 = vld [vmem:[#allocation2 + $0x18] sm:$0xff] }
  0x2e   :  { %1145 = vmatpush3.bf16.msra.mxu0 %v1142_v5  ;;  %1179 = vmatpush3.bf16.msra.mxu1 %v1142_v5  ;;  %v50_v31 = vld [vmem:[#allocation2 + $0x38] sm:$0xff]  ;;  %v1398_v32 = vld [vmem:[%s1989_s2] ss:$0 sm:$0xff] }
  0x2f   :  { %1147 = vmatprep.subr.bf16.mxu0 %v1146_v8  ;;  %1172 = vmatprep.subr.bf16.mxu1 %v1146_v8 }
  0x32   :  { %1149 = vmatpush3.bf16.msra.mxu0 %v1146_v8  ;;  %1180 = vmatpush3.bf16.msra.mxu1 %v1146_v8  ;;  %v1338_v8 = vmov 683565275  }
  0x33   :  { %1151 = vmatprep.subr.bf16.mxu0 %v1150_v13  ;;  %1173 = vmatprep.subr.bf16.mxu1 %v1150_v13 }
  0x36   :  { %1153 = vmatpush3.bf16.msra.mxu0 %v1150_v13  ;;  %1181 = vmatpush3.bf16.msra.mxu1 %v1150_v13 }
  0x37   :  { %1155 = vmatprep.subr.bf16.mxu0 %v1154_v16  ;;  %1174 = vmatprep.subr.bf16.mxu1 %v1154_v16 }
  0x3a   :  { %1157 = vmatpush3.bf16.msra.mxu0 %v1154_v16  ;;  %1182 = vmatpush3.bf16.msra.mxu1 %v1154_v16  ;;  %v1341_v16 = vmov 2102212464  }
  0x3b   :  { %1159 = vmatprep.subr.bf16.mxu0 %v1158_v19  ;;  %1175 = vmatprep.subr.bf16.mxu1 %v1158_v19 }
  0x3e   :  { %1161 = vmatpush3.bf16.msra.mxu0 %v1158_v19  ;;  %1183 = vmatpush3.bf16.msra.mxu1 %v1158_v19 }
  0x3f   :  { %1163 = vmatprep.subr.bf16.mxu0 %v1162_v22  ;;  %1176 = vmatprep.subr.bf16.mxu1 %v1162_v22 }
  0x42   :  { %1165 = vmatpush3.bf16.msra.mxu0 %v1162_v22  ;;  %1184 = vmatpush3.bf16.msra.mxu1 %v1162_v22 }
  0x43   :  { %1167 = vmatprep.subr.bf16.mxu0 %v1166_v25  ;;  %1177 = vmatprep.subr.bf16.mxu1 %v1166_v25 }
  0x46   :  { %1169 = vmatpush3.bf16.msra.mxu0 %v1166_v25  ;;  %1185 = vmatpush3.bf16.msra.mxu1 %v1166_v25  ;;  %v1343_v25 = vmov 1326507024  }
  0x49   :  { %1127 = vmatmul.mubr.f32.vlgmr.msra.gmra.mrb[0].mxu0 %v44_v26  ;;  %1133 = vmatmul.mubr.f32.vlgmr.msra.gmra.mrb[0].mxu1 %v48_v27 }
  0x4a   :  { %1129 = vmatprep.mubr.f32.mxu0 %v45_v28  ;;  %1135 = vmatprep.mubr.f32.mxu1 %v49_v29 }
  0x4d   :  { %1130 = vmatmul.mubr.f32.gmra.mrb[2].mxu0 %v46_v30  ;;  %1136 = vmatmul.mubr.f32.gmra.mrb[2].mxu1 %v50_v31 }
 0x11c   :  { %v1128_v33 = vpop.f32.mrb[0].mxu0  ;;  %v1134_v34 = vpop.f32.mrb[0].mxu1 }
 0x11d   :  { %v1401_v35 = vadd.f32 %v1128_v33, %v1398_v32  ;;  %v1404_v36 = vadd.f32 %v1134_v34, %v1398_v32  ;;  %v140_v37 = vpop.f32.mrb[1].mxu0  ;;  %v160_v38 = vpop.f32.mrb[1].mxu1 }
 0x11e   :  { %v1407_v39 = vadd.f32 %v1398_v32, %v140_v37  ;;  %v1428_v2 = vadd.f32 %v1398_v32, %v160_v38 }
 0x11f   :  { %v282_v40 = vand.u32 2147483647, %v1401_v35  ;;  %v285_v41 = vand.u32 2139095040, %v1401_v35  ;;  %v694_v42 = vand.u32 2147483647, %v1404_v36  ;;  %v697_v43 = vand.u32 2139095040, %v1404_v36 }
 0x120   :  { %v1413_v44 = vpop.f32.mrb[2].mxu0  ;;  %v1415_v45 = vpop.f32.mrb[2].mxu1  ;;  %v182_v50 = vand.u32 2139095040, %v1407_v39  ;;  %v179_v60 = vand.u32 2147483647, %v1407_v39  ;;  %vm284_vm13 = vcmp.lt.s32.totalorder %v1401_v35, 0 }
 0x121   :  { %v286_v46 = vshrl.u32 %v285_v41, 23  ;;  %v289_v47 = vand.u32 8388607, %v282_v40  ;;  %v698_v48 = vshrl.u32 %v697_v43, 23  ;;  %v701_v49 = vand.u32 8388607, %v694_v42 }
 0x122   :  { %v1422_v52 = vpop.f32.mrb[3].mxu0  ;;  %v1424_v53 = vpop.f32.mrb[3].mxu1  ;;  %v183_v55 = vshrl.u32 %v182_v50, 23  ;;  %v1436_v5 = vand.u32 8388607, %v179_v60 }
 0x123   :  { %v1042_v51 = vadd.s32 4294967169, %v286_v46  ;;  %v1058_v54 = vadd.s32 4294967169, %v698_v48  ;;  %v290_v56 = vor.u32 8388608, %v289_v47  ;;  %v702_v58 = vor.u32 8388608, %v701_v49 }
 0x124   :  { %v1038_v61 = vadd.s32 4294967169, %v183_v55 }
 0x125   :  { %v292_v57 = vadd.s32 1, %v1042_v51  ;;  %v704_v59 = vadd.s32 1, %v1058_v54  ;;  %v1430_v3 = vshll.u32 %v290_v56, 8  ;;  %v1432_v4 = vshll.u32 %v702_v58, 8 }
 0x126   :  { %v1438_v6 = vadd.s32 1, %v1038_v61 }
 0x127   :  { %vm293_vm0 = vcmp.gt.s32.totalorder %v292_v57, 0  ;;  %vm705_vm1 = vcmp.gt.s32.totalorder %v704_v59, 0 }
 0x128   :  { %v294_v62 = vsel %vm293_vm0, %v292_v57, 0  ;;  %v706_v1 = vsel %vm705_vm1, %v704_v59, 0  ;;  %vm190_vm6 = vcmp.gt.s32.totalorder %v1438_v6, 0 }
 0x129   :  { %v295_v63 = vshrl.u32 %v294_v62, 5  ;;  %v296_v0 = vand.u32 31, %v294_v62  ;;  %v1441_v10 = vshrl.u32 %v706_v1, 5  ;;  %v708_v11 = vand.u32 31, %v706_v1 }
 0x12b   :  { %v297_v7 = vsub.s32 32, %v296_v0  ;;  %v299_v9 = vshll.u32 %v1338_v8, %v296_v0  ;;  %v302_v13 = vshll.u32 %v1339_v12, %v296_v0  ;;  %v305_v15 = vshll.u32 %v1340_v14, %v296_v0 }
 0x12c   :  { %v308_v17 = vshll.u32 %v1341_v16, %v296_v0  ;;  %v311_v19 = vshll.u32 %v1342_v18, %v296_v0  ;;  %vm314_vm2 = vcmp.lt.s32.totalorder %v295_v63, 1  ;;  %vm315_vm3 = vcmp.lt.s32.totalorder %v295_v63, 2 }
 0x12d   :  { %v300_v20 = vshrl.u32 %v1339_v12, %v297_v7  ;;  %v303_v21 = vshrl.u32 %v1340_v14, %v297_v7  ;;  %v306_v22 = vshrl.u32 %v1341_v16, %v297_v7  ;;  %v298_v23 = vshrl.u32 %v1338_v8, %v297_v7 }
 0x12e   :  { %v309_v24 = vshrl.u32 %v1342_v18, %v297_v7  ;;  %v312_v26 = vshrl.u32 %v1343_v25, %v297_v7  ;;  %v709_v30 = vsub.s32 32, %v708_v11  ;;  %vm316_vm4 = vcmp.lt.s32.totalorder %v295_v63, 3 }
 0x12f   :  { %v301_v27 = vor.u32 %v300_v20, %v299_v9  ;;  %v304_v28 = vor.u32 %v303_v21, %v302_v13  ;;  %v307_v29 = vor.u32 %v306_v22, %v305_v15  ;;  %vm317_vm5 = vcmp.lt.s32.totalorder %v295_v63, 4 }
 0x130   :  { %v310_v31 = vor.u32 %v309_v24, %v308_v17  ;;  %v313_v33 = vor.u32 %v312_v26, %v311_v19  ;;  %v711_v48 = vshll.u32 %v1338_v8, %v708_v11  ;;  %v712_v51 = vshrl.u32 %v1339_v12, %v709_v30 }
 0x131   :  { %v318_v34 = vsel %vm314_vm2, %v298_v23, %v301_v27  ;;  %v319_v37 = vsel %vm317_vm5, %v307_v29, 2102212464  ;;  %v322_v38 = vsel %vm314_vm2, %v301_v27, %v304_v28  ;;  %v326_v41 = vsel %vm314_vm2, %v304_v28, %v307_v29 }
 0x132   :  { %v320_v43 = vsel %vm316_vm4, %v304_v28, %v319_v37  ;;  %v323_v46 = vsel %vm317_vm5, %v310_v31, 920167782  ;;  %v327_v47 = vsel %vm317_vm5, %v313_v33, 1326507024  ;;  %v714_v54 = vshll.u32 %v1339_v12, %v708_v11 }
 0x133   :  { %v324_v49 = vsel %vm316_vm4, %v307_v29, %v323_v46  ;;  %v328_v50 = vsel %vm316_vm4, %v310_v31, %v327_v47  ;;  %v321_v55 = vsel %vm315_vm3, %v318_v34, %v320_v43  ;;  %v715_v58 = vshrl.u32 %v1340_v14, %v709_v30 }
 0x134   :  { %v325_v56 = vsel %vm315_vm3, %v322_v38, %v324_v49  ;;  %v329_v57 = vsel %vm315_vm3, %v326_v41, %v328_v50  ;;  %v713_v1 = vor.u32 %v712_v51, %v711_v48  ;;  %v717_v9 = vshll.u32 %v1340_v14, %v708_v11 }
 0x135   :  { %v1465_v59 = vmul.u32.u64.low %v1430_v3, %v329_v57  ;;  %v1466_v61 = vmul.u32.u64.high %v1430_v3, %v329_v57, %v1465_v59  ;;  %v1469_v62 = vmul.u32.u64.low %v1430_v3, %v325_v56  ;;  %v1470_v0 = vmul.u32.u64.high %v1430_v3, %v325_v56, %v1469_v62 }
 0x136   :  { %v716_v7 = vor.u32 %v715_v58, %v714_v54  ;;  %v718_v13 = vshrl.u32 %v1341_v16, %v709_v30  ;;  %v710_v63 = vshrl.u32 %v1338_v8, %v709_v30  ;;  %v720_v15 = vshll.u32 %v1341_v16, %v708_v11 }
 0x137   :  { %v721_v17 = vshrl.u32 %v1342_v18, %v709_v30  ;;  %v724_v19 = vshrl.u32 %v1343_v25, %v709_v30  ;;  %v337_v20 = vmul.u32 %v1430_v3, %v321_v55  ;;  %v723_v22 = vshll.u32 %v1342_v18, %v708_v11 }
 0x138   :  { %v719_v21 = vor.u32 %v718_v13, %v717_v9  ;;  %vm726_vm7 = vcmp.lt.s32.totalorder %v1441_v10, 1  ;;  %vm339_vm8 = vc.u32 %v1466_v61, %v1469_v62  ;;  %v340_v23 = vadd.s32 1, %v1470_v0 }
 0x139   :  { %v722_v24 = vor.u32 %v721_v17, %v720_v15  ;;  %vm727_vm9 = vcmp.lt.s32.totalorder %v1441_v10, 2  ;;  %v725_v26 = vor.u32 %v724_v19, %v723_v22  ;;  %vm728_vm10 = vcmp.lt.s32.totalorder %v1441_v10, 3 }
 0x13a   :  { %vm729_vm11 = vcmp.lt.s32.totalorder %v1441_v10, 4  ;;  %v734_v27 = vsel %vm726_vm7, %v713_v1, %v716_v7  ;;  %v341_v3 = vsel %vm339_vm8, %v340_v23, %v1470_v0  ;;  %v738_v29 = vsel %vm726_vm7, %v716_v7, %v719_v21 }
 0x13b   :  { %v731_v28 = vsel %vm729_vm11, %v719_v21, 2102212464  ;;  %v735_v11 = vsel %vm729_vm11, %v722_v24, 920167782  ;;  %v342_v30 = vadd.s32 %v341_v3, %v337_v20  ;;  %v730_v31 = vsel %vm726_vm7, %v710_v63, %v713_v1 }
 0x13c   :  { %v736_v33 = vsel %vm728_vm10, %v719_v21, %v735_v11  ;;  %v739_v34 = vsel %vm729_vm11, %v725_v26, 1326507024  ;;  %v732_v37 = vsel %vm728_vm10, %v716_v7, %v731_v28  ;;  %v191_v43 = vsel %vm190_vm6, %v1438_v6, 0 }
 0x13d   :  { %v737_v38 = vsel %vm727_vm9, %v734_v27, %v736_v33  ;;  %v740_v41 = vsel %vm728_vm10, %v722_v24, %v739_v34  ;;  %v343_v46 = vadd.s32 536870912, %v342_v30  ;;  %v733_v55 = vsel %vm727_vm9, %v730_v31, %v732_v37 }
 0x13e   :  { %v741_v47 = vsel %vm727_vm9, %v738_v29, %v740_v41  ;;  %v1497_v48 = vmul.u32.u64.low %v1432_v4, %v737_v38  ;;  %v1498_v49 = vmul.u32.u64.high %v1432_v4, %v737_v38, %v1497_v48  ;;  %v193_v56 = vand.u32 31, %v191_v43 }
 0x13f   :  { %v1502_v50 = vmul.u32.u64.low %v1432_v4, %v741_v47  ;;  %v1503_v51 = vmul.u32.u64.high %v1432_v4, %v741_v47, %v1502_v50  ;;  %v1505_v54 = vshrl.u32 %v343_v46, 30  ;;  %v594_v6 = vand.u32 2139095040, %v1428_v2 }
 0x140   :  { %v591_v57 = vand.u32 2147483647, %v1428_v2  ;;  %v752_v59 = vadd.s32 1, %v1498_v49  ;;  %v187_v0 = vor.u32 8388608, %v1436_v5  ;;  %v194_v1 = vsub.s32 32, %v193_v56 }
 0x141   :  { %v345_v58 = vshll.u32 %v1505_v54, 30  ;;  %v749_v7 = vmul.u32 %v1432_v4, %v733_v55  ;;  %vm751_vm12 = vc.u32 %v1503_v51, %v1497_v48  ;;  %v595_v13 = vshrl.u32 %v594_v6, 23 }
 0x142   :  { %v753_v10 = vsel %vm751_vm12, %v752_v59, %v1498_v49  ;;  %v197_v15 = vshrl.u32 %v1339_v12, %v194_v1  ;;  %v200_v17 = vshrl.u32 %v1340_v14, %v194_v1  ;;  %v1524_v19 = vand.u32 8388607, %v591_v57 }
 0x143   :  { %v1517_v9 = vsub.s32 %v342_v30, %v345_v58  ;;  %v754_v63 = vadd.s32 %v753_v10, %v749_v7  ;;  %v196_v4 = vshll.u32 %v1338_v8, %v193_v56  ;;  %v203_v20 = vshrl.u32 %v1341_v16, %v194_v1 }
 0x144   :  { %v1529_v21 = vshll.u32 %v187_v0, 8  ;;  %v338_v22 = vadd.s32 %v1469_v62, %v1466_v61  ;;  %v192_v24 = vshrl.u32 %v191_v43, 5  ;;  %v199_v26 = vshll.u32 %v1339_v12, %v193_v56 }
 0x145   :  { %v348_v5 = vsub.s32 0, %v1517_v9  ;;  %v755_v23 = vadd.s32 536870912, %v754_v63  ;;  %v198_v3 = vor.u32 %v197_v15, %v196_v4  ;;  %v202_v28 = vshll.u32 %v1340_v14, %v193_v56 }
 0x146   :  { %v1054_v11 = vadd.s32 4294967169, %v595_v13  ;;  %v201_v30 = vor.u32 %v200_v17, %v199_v26  ;;  %v205_v31 = vshll.u32 %v1341_v16, %v193_v56  ;;  %v206_v33 = vshrl.u32 %v1342_v18, %v194_v1 }
 0x147   :  { %v1043_v27 = vmin.u32 %v348_v5, %v1517_v9  ;;  %v1537_v29 = vshrl.u32 %v755_v23, 30  ;;  %v204_v37 = vor.u32 %v203_v20, %v202_v28  ;;  %v208_v61 = vshll.u32 %v1342_v18, %v193_v56 }
 0x148   :  { %v209_v62 = vshrl.u32 %v1343_v25, %v194_v1  ;;  %v207_v41 = vor.u32 %v206_v33, %v205_v31  ;;  %vm211_vm14 = vcmp.lt.s32.totalorder %v192_v24, 1  ;;  %vm212_vm15 = vcmp.lt.s32.totalorder %v192_v24, 2 }
 0x149   :  { %v350_v34 = vclz %v1043_v27  ;;  %v757_v38 = vshll.u32 %v1537_v29, 30  ;;  %v368_v46 = vsub.s32 4, %v1505_v54  ;;  %vm214_vm0 = vcmp.lt.s32.totalorder %v192_v24, 4 }
 0x14a   :  { %v210_v47 = vor.u32 %v209_v62, %v208_v61  ;;  %vm213_vm1 = vcmp.lt.s32.totalorder %v192_v24, 3  ;;  %v219_v50 = vsel %vm211_vm14, %v198_v3, %v201_v30  ;;  %v220_v55 = vsel %vm214_vm0, %v207_v41, 920167782 }
 0x14b   :  { %v1044_v43 = vadd.s32 4294967294, %v350_v34  ;;  %v1545_v49 = vsub.s32 %v754_v63, %v757_v38  ;;  %v216_v56 = vsel %vm214_vm0, %v204_v37, 2102212464  ;;  %v221_v6 = vsel %vm213_vm1, %v204_v37, %v220_v55 }
 0x14c   :  { %v224_v58 = vsel %vm214_vm0, %v210_v47, 1326507024  ;;  %v195_v7 = vshrl.u32 %v1338_v8, %v194_v1  ;;  %v223_v10 = vsel %vm211_vm14, %v201_v30, %v204_v37  ;;  %v369_v63 = vsel %vm284_vm13, %v368_v46, %v1505_v54 }
 0x14d   :  { %vm1045_vm2 = vcmp.lt.s32.totalorder %v1044_v43, 0  ;;  %v760_v0 = vsub.s32 0, %v1545_v49  ;;  %v225_v17 = vsel %vm213_vm1, %v207_v41, %v224_v58  ;;  %v217_v20 = vsel %vm213_vm1, %v201_v30, %v216_v56 }
 0x14e   :  { %v353_v59 = vsel %vm1045_vm2, 0, %v1044_v43  ;;  %v215_v4 = vsel %vm211_vm14, %v195_v7, %v198_v3  ;;  %v222_v23 = vsel %vm212_vm15, %v219_v50, %v221_v6  ;;  %v226_v28 = vsel %vm212_vm15, %v223_v10, %v225_v17 }
 0x14f   :  { %v354_v13 = vsub.s32 32, %v353_v59  ;;  %v358_v15 = vsub.s32 4294967266, %v353_v59  ;;  %v1059_v5 = vmin.u32 %v760_v0, %v1545_v49  ;;  %v355_v1 = vshll.u32 %v1517_v9, %v353_v59 }
 0x150   :  { %vm696_vm3 = vcmp.lt.s32.totalorder %v1404_v36, 0  ;;  %v1564_v54 = vmul.u32.u64.low %v1529_v21, %v226_v28  ;;  %v1565_v33 = vmul.u32.u64.high %v1529_v21, %v226_v28, %v1564_v54  ;;  %v601_v34 = vadd.s32 1, %v1054_v11 }
 0x151   :  { %v356_v26 = vshrl.u32 %v338_v22, %v354_v13  ;;  %v359_v27 = vadd.s32 127, %v358_v15  ;;  %v762_v31 = vclz %v1059_v5  ;;  %vm1574_vm4 = vcmp.le.f32.partialorder %v282_v40, 0.7853982 }
 0x152   :  { %v1568_v30 = vmul.u32.u64.low %v1529_v21, %v222_v23  ;;  %v1569_v61 = vmul.u32.u64.high %v1529_v21, %v222_v23, %v1568_v30  ;;  %v599_v62 = vor.u32 8388608, %v1524_v19  ;;  %vm602_vm5 = vcmp.gt.s32.totalorder %v601_v34, 0 }
 0x153   :  { %v357_v37 = vor.u32 %v356_v26, %v355_v1  ;;  %v360_v3 = vshll.u32 %v359_v27, 23  ;;  %v1060_v22 = vadd.s32 4294967294, %v762_v31  ;;  %v371_v11 = vsel %vm1574_vm4, 0, %v369_v63 }
 0x154   :  { %v218_v41 = vsel %vm212_vm15, %v215_v4, %v217_v20  ;;  %v603_v43 = vsel %vm602_vm5, %v601_v34, 0  ;;  %v780_v47 = vsub.s32 4, %v1537_v29  ;;  %vm236_vm7 = vc.u32 %v1565_v33, %v1568_v30 }
 0x155   :  { %v361_v38 = vor.u32 4788187, %v360_v3  ;;  %v364_v46 = vcvt.s32.f32 %v357_v37  ;;  %vm1061_vm6 = vcmp.lt.s32.totalorder %v1060_v22, 0  ;;  %v237_v55 = vadd.s32 1, %v1569_v61 }
 0x156   :  { %v765_v50 = vsel %vm1061_vm6, 0, %v1060_v22  ;;  %v605_v56 = vand.u32 31, %v603_v43  ;;  %v750_v6 = vadd.s32 %v1497_v48, %v1503_v51  ;;  %v234_v24 = vmul.u32 %v1529_v21, %v218_v41 }
 0x157   :  { %v362_v40 = vand.u32 2147483647, %v361_v38  ;;  %v766_v58 = vsub.s32 32, %v765_v50  ;;  %v770_v59 = vsub.s32 4294967266, %v765_v50  ;;  %v1589_v7 = vand.u32 3, %v371_v11 }
 0x158   :  { %vm1593_vm8 = vcmp.le.f32.partialorder %v694_v42, 0.7853982  ;;  %v238_v13 = vsel %vm236_vm7, %v237_v55, %v1569_v61  ;;  %v606_v15 = vsub.s32 32, %v605_v56  ;;  %v767_v63 = vshll.u32 %v1545_v49, %v765_v50 }
 0x159   :  { %v365_v0 = vmul.f32 %v364_v46, %v362_v40  ;;  %v768_v17 = vshrl.u32 %v750_v6, %v766_v58  ;;  %v771_v48 = vadd.s32 127, %v770_v59  ;;  %v239_v51 = vadd.s32 %v238_v13, %v234_v24 }
 0x15a   :  { %v1602_v21 = vsel %vm696_vm3, %v780_v47, %v1537_v29  ;;  %v1604_v4 = vshrl.u32 %v603_v43, 5  ;;  %v608_v42 = vshll.u32 %v1338_v8, %v605_v56  ;;  %v611_v26 = vshll.u32 %v1339_v12, %v605_v56 }
 0x15b   :  { %v366_v5 = vxor.u32 2147483648, %v365_v0  ;;  %v769_v20 = vor.u32 %v768_v17, %v767_v63  ;;  %v772_v23 = vshll.u32 %v771_v48, 23  ;;  %v240_v1 = vadd.s32 536870912, %v239_v51 }
 0x15c   :  { %v609_v27 = vshrl.u32 %v1339_v12, %v606_v15  ;;  %v612_v28 = vshrl.u32 %v1340_v14, %v606_v15  ;;  %v615_v31 = vshrl.u32 %v1341_v16, %v606_v15  ;;  %v614_v37 = vshll.u32 %v1340_v14, %v605_v56 }
 0x15d   :  { %v367_v49 = vsel %vm284_vm13, %v366_v5, %v365_v0  ;;  %v773_v54 = vor.u32 4788187, %v772_v23  ;;  %v1616_v34 = vshrl.u32 %v240_v1, 30  ;;  %v776_v3 = vcvt.s32.f32 %v769_v20 }
 0x15e   :  { %v370_v29 = vsel %vm1574_vm4, %v1401_v35, %v367_v49  ;;  %v617_v61 = vshll.u32 %v1341_v16, %v605_v56  ;;  %v618_v22 = vshrl.u32 %v1342_v18, %v606_v15  ;;  %v616_v41 = vor.u32 %v615_v31, %v614_v37 }
 0x15f   :  { %1229 = vcosq.f32 %v370_v29  ;;  %v774_v38 = vand.u32 2147483647, %v773_v54  ;;  %v242_v11 = vshll.u32 %v1616_v34, 30  ;;  %v610_v43 = vor.u32 %v609_v27, %v608_v42 }
 0x160   :  { %1231 = vsinq.f32 %v370_v29  ;;  %v613_v46 = vor.u32 %v612_v28, %v611_v26  ;;  %v619_v9 = vor.u32 %v618_v22, %v617_v61  ;;  %v621_v47 = vshrl.u32 %v1343_v25, %v606_v15 }
 0x161   :  { %v777_v40 = vmul.f32 %v776_v3, %v774_v38  ;;  %v783_v50 = vsel %vm1593_vm8, 0, %v1602_v21  ;;  %v1626_v55 = vsub.s32 %v239_v51, %v242_v11  ;;  %v620_v6 = vshll.u32 %v1342_v18, %v605_v56 }
 0x162   :  { %vm380_vm9 = vcmp.eq.s32.totalorder %v1589_v7, 2  ;;  %v607_v58 = vshrl.u32 %v1338_v8, %v606_v15  ;;  %vm623_vm10 = vcmp.lt.s32.totalorder %v1604_v4, 1  ;;  %vm626_vm11 = vcmp.lt.s32.totalorder %v1604_v4, 4 }
 0x163   :  { %v639_v59 = vshll.u32 %v599_v62, 8  ;;  %vm377_vm12 = vcmp.eq.s32.totalorder %v1589_v7, 0  ;;  %v778_v24 = vxor.u32 2147483648, %v777_v40  ;;  %v245_v0 = vsub.s32 0, %v1626_v55 }
 0x164   :  { %v622_v13 = vor.u32 %v621_v47, %v620_v6  ;;  %v628_v56 = vsel %vm626_vm11, %v616_v41, 2102212464  ;;  %vm376_vm13 = vcmp.lt.s32.totalorder %v1589_v7, 2  ;;  %vm624_vm14 = vcmp.lt.s32.totalorder %v1604_v4, 2 }
 0x165   :  { %v631_v15 = vsel %vm623_vm10, %v610_v43, %v613_v46  ;;  %v632_v19 = vsel %vm626_vm11, %v619_v9, 920167782  ;;  %v1647_v62 = vadd.f32 %v1413_v44, %v1398_v32  ;;  %vm374_vm15 = vweird.f32 %v1401_v35 }
 0x166   :  { %v779_v63 = vsel %vm696_vm3, %v778_v24, %v777_v40  ;;  %v1039_v17 = vmin.u32 %v245_v0, %v1626_v55  ;;  %vm625_vm0 = vcmp.lt.s32.totalorder %v1604_v4, 3  ;;  %v627_v48 = vsel %vm623_vm10, %v607_v58, %v610_v43 }
 0x167   :  { %v782_v51 = vsel %vm1593_vm8, %v1404_v36, %v779_v63  ;;  %v629_v5 = vsel %vm625_vm0, %v613_v46, %v628_v56  ;;  %v633_v21 = vsel %vm625_vm0, %v616_v41, %v632_v19  ;;  %v635_v44 = vsel %vm623_vm10, %v613_v46, %v616_v41 }
 0x168   :  { %1233 = vcosq.f32 %v782_v51  ;;  %v247_v42 = vclz %v1039_v17  ;;  %v634_v20 = vsel %vm624_vm14, %v631_v15, %v633_v21  ;;  %v636_v23 = vsel %vm626_vm11, %v622_v13, 1326507024 }
 0x169   :  { %v1230_v1 = vpop.eup %1229  ;;  %1235 = vsinq.f32 %v782_v51  ;;  %v637_v26 = vsel %vm625_vm0, %v619_v9, %v636_v23  ;;  %v1665_v49 = vmul.u32.u64.low %v639_v59, %v634_v20  ;;  %v1666_v27 = vmul.u32.u64.high %v639_v59, %v634_v20, %v1665_v49 }
 0x16a   :  { %v1232_v10 = vpop.eup %1231  ;;  %v381_v28 = vxor.u32 2147483648, %v1230_v1  ;;  %v787_v31 = vand.u32 3, %v783_v50  ;;  %v1040_v29 = vadd.s32 4294967294, %v247_v42  ;;  %v638_v54 = vsel %vm624_vm14, %v635_v44, %v637_v26 }
 0x16b   :  { %v378_v37 = vxor.u32 2147483648, %v1232_v10  ;;  %v630_v3 = vsel %vm624_vm14, %v627_v48, %v629_v5  ;;  %v1673_v61 = vmul.u32.u64.low %v639_v59, %v638_v54  ;;  %v1674_v22 = vmul.u32.u64.high %v639_v59, %v638_v54, %v1673_v61 }
 0x16c   :  { %v382_v38 = vsel %vm380_vm9, %v381_v28, %v1232_v10  ;;  %v235_v11 = vadd.s32 %v1568_v30, %v1565_v33  ;;  %vm1041_vm1 = vcmp.lt.s32.totalorder %v1040_v29, 0  ;;  %v491_v41 = vand.u32 2139095040, %v1647_v62 }
 0x16d   :  { %v379_v43 = vsel %vm377_vm12, %v1230_v1, %v378_v37  ;;  %v250_v46 = vsel %vm1041_vm1, 0, %v1040_v29  ;;  %v265_v9 = vsub.s32 4, %v1616_v34  ;;  %v649_v4 = vadd.s32 1, %v1666_v27 }
 0x16e   :  { %v383_v47 = vsel %vm376_vm13, %v379_v43, %v382_v38  ;;  %v251_v40 = vsub.s32 32, %v250_v46  ;;  %v255_v50 = vsub.s32 4294967266, %v250_v46  ;;  %v646_v6 = vmul.u32 %v639_v59, %v630_v3 }
 0x16f   :  { %v384_v33 = vsel %vm374_vm15, nan, %v383_v47  ;;  %v252_v30 = vshll.u32 %v1626_v55, %v250_v46  ;;  %vm648_vm2 = vc.u32 %v1674_v22, %v1665_v49  ;;  %v492_v58 = vshrl.u32 %v491_v41, 23 }
 0x170   :  { %v1004_v24 = vmul.f32 0.25, %v384_v33  ;;  %v253_v0 = vshrl.u32 %v235_v11, %v251_v40  ;;  %v256_v13 = vadd.s32 127, %v255_v50  ;;  %v650_v56 = vsel %vm648_vm2, %v649_v4, %v1666_v27 }
 0x171   :  { %vm181_vm3 = vcmp.lt.s32.totalorder %v1407_v39, 0  ;;  %v651_v7 = vadd.s32 %v650_v56, %v646_v6  ;;  %v488_v15 = vand.u32 2147483647, %v1647_v62  ;;  %v1050_v59 = vadd.s32 4294967169, %v492_v58 }
 0x172   :  { %v1234_v19 = vpop.eup %1233  ;;  %1012 = vst [vmem:[#allocation7 + $0x8] sm:$0xff] %v1004_v24  ;;  %vm788_vm4 = vcmp.lt.s32.totalorder %v787_v31, 2  ;;  %vm1697_vm5 = vcmp.le.f32.partialorder %v179_v60, 0.7853982  ;;  %v254_v55 = vor.u32 %v253_v0, %v252_v30  ;;  %v257_v63 = vshll.u32 %v256_v13, 23 }
 0x173   :  { %v1236_v17 = vpop.eup %1235  ;;  %vm789_vm6 = vcmp.eq.s32.totalorder %v787_v31, 0  ;;  %v793_v48 = vxor.u32 2147483648, %v1234_v19  ;;  %v652_v51 = vadd.s32 536870912, %v651_v7  ;;  %v498_v5 = vadd.s32 1, %v1050_v59 }
 0x174   :  { %v790_v21 = vxor.u32 2147483648, %v1236_v17  ;;  %vm792_vm7 = vcmp.eq.s32.totalorder %v787_v31, 2  ;;  %v258_v44 = vor.u32 4788187, %v257_v63  ;;  %v266_v42 = vsel %vm181_vm3, %v265_v9, %v1616_v34 }
 0x175   :  { %v794_v20 = vsel %vm792_vm7, %v793_v48, %v1236_v17  ;;  %v1704_v23 = vshrl.u32 %v652_v51, 30  ;;  %v495_v60 = vand.u32 8388607, %v488_v15  ;;  %vm499_vm8 = vcmp.gt.s32.totalorder %v498_v5, 0 }
 0x176   :  { %v791_v1 = vsel %vm789_vm6, %v1234_v19, %v790_v21  ;;  %v259_v26 = vand.u32 2147483647, %v258_v44  ;;  %v261_v27 = vcvt.s32.f32 %v254_v55  ;;  %v500_v10 = vsel %vm499_vm8, %v498_v5, 0 }
 0x177   :  { %vm786_vm9 = vweird.f32 %v1404_v36  ;;  %v795_v28 = vsel %vm788_vm4, %v791_v1, %v794_v20  ;;  %v268_v29 = vsel %vm1697_vm5, 0, %v266_v42  ;;  %v654_v34 = vshll.u32 %v1704_v23, 30 }
 0x178   :  { %v796_v54 = vsel %vm786_vm9, nan, %v795_v28  ;;  %v262_v37 = vmul.f32 %v261_v27, %v259_v26  ;;  %v502_v3 = vand.u32 31, %v500_v10  ;;  %v496_v11 = vor.u32 8388608, %v495_v60 }
 0x179   :  { %v1008_v61 = vmul.f32 0.25, %v796_v54  ;;  %v1713_v38 = vsub.s32 %v651_v7, %v654_v34  ;;  %v501_v41 = vshrl.u32 %v500_v10, 5  ;;  %v1715_v46 = vand.u32 3, %v268_v29 }
 0x17a   :  { %v263_v43 = vxor.u32 2147483648, %v262_v37  ;;  %v503_v9 = vsub.s32 32, %v502_v3  ;;  %v647_v36 = vadd.s32 %v1665_v49, %v1674_v22  ;;  %v505_v4 = vshll.u32 %v1338_v8, %v502_v3 }
 0x17b   :  { %1016 = vst [vmem:[#allocation7 + $0x28] sm:$0xff] %v1008_v61  ;;  %v657_v31 = vsub.s32 0, %v1713_v38  ;;  %v1723_v47 = vadd.f32 %v1415_v45, %v1398_v32  ;;  %v508_v6 = vshll.u32 %v1339_v12, %v502_v3  ;;  %vm520_vm10 = vcmp.lt.s32.totalorder %v501_v41, 1 }
 0x17c   :  { %v264_v40 = vsel %vm181_vm3, %v263_v43, %v262_v37  ;;  %v506_v50 = vshrl.u32 %v1339_v12, %v503_v9  ;;  %v509_v33 = vshrl.u32 %v1340_v14, %v503_v9  ;;  %v1734_v30 = vshll.u32 %v496_v11, 8 }
 0x17d   :  { %v267_v49 = vsel %vm1697_vm5, %v1407_v39, %v264_v40  ;;  %v1055_v22 = vmin.u32 %v657_v31, %v1713_v38  ;;  %v511_v24 = vshll.u32 %v1340_v14, %v502_v3  ;;  %v504_v13 = vshrl.u32 %v1338_v8, %v503_v9 }
 0x17e   :  { %1237 = vcosq.f32 %v267_v49  ;;  %v507_v45 = vor.u32 %v506_v50, %v505_v4  ;;  %v510_v58 = vor.u32 %v509_v33, %v508_v6  ;;  %v512_v56 = vshrl.u32 %v1341_v16, %v503_v9 }
 0x17f   :  { %1239 = vsinq.f32 %v267_v49  ;;  %v659_v0 = vclz %v1055_v22  ;;  %v514_v7 = vshll.u32 %v1341_v16, %v502_v3  ;;  %v515_v59 = vshrl.u32 %v1342_v18, %v503_v9 }
 0x180   :  { %v517_v19 = vshll.u32 %v1342_v18, %v502_v3  ;;  %v518_v35 = vshrl.u32 %v1343_v25, %v503_v9  ;;  %v513_v63 = vor.u32 %v512_v56, %v511_v24  ;;  %vm522_vm11 = vcmp.lt.s32.totalorder %v501_v41, 3 }
 0x181   :  { %v1056_v55 = vadd.s32 4294967294, %v659_v0  ;;  %vm523_vm12 = vcmp.lt.s32.totalorder %v501_v41, 4  ;;  %v516_v17 = vor.u32 %v515_v59, %v514_v7  ;;  %v524_v51 = vsel %vm520_vm10, %v504_v13, %v507_v45 }
 0x182   :  { %v519_v48 = vor.u32 %v518_v35, %v517_v19  ;;  %v528_v5 = vsel %vm520_vm10, %v507_v45, %v510_v58  ;;  %v525_v21 = vsel %vm523_vm12, %v513_v63, 2102212464  ;;  %v532_v44 = vsel %vm520_vm10, %v510_v58, %v513_v63 }
 0x183   :  { %vm1057_vm13 = vcmp.lt.s32.totalorder %v1056_v55, 0  ;;  %v903_v42 = vand.u32 2139095040, %v1723_v47  ;;  %vm273_vm14 = vcmp.lt.s32.totalorder %v1715_v46, 2  ;;  %v526_v60 = vsel %vm522_vm11, %v510_v58, %v525_v21 }
 0x184   :  { %v662_v20 = vsel %vm1057_vm13, 0, %v1056_v55  ;;  %v529_v1 = vsel %vm523_vm12, %v516_v17, 920167782  ;;  %v533_v26 = vsel %vm523_vm12, %v519_v48, 1326507024  ;;  %vm271_vm15 = vweird.f32 %v1407_v39 }
 0x185   :  { %v663_v27 = vsub.s32 32, %v662_v20  ;;  %v664_v10 = vshll.u32 %v1713_v38, %v662_v20  ;;  %v667_v28 = vsub.s32 4294967266, %v662_v20  ;;  %vm521_vm0 = vcmp.lt.s32.totalorder %v501_v41, 2 }
 0x186   :  { %vm593_vm1 = vcmp.lt.s32.totalorder %v1428_v2, 0  ;;  %v527_v29 = vsel %vm521_vm0, %v524_v51, %v526_v60  ;;  %v530_v34 = vsel %vm522_vm11, %v513_v63, %v529_v1  ;;  %v534_v54 = vsel %vm522_vm11, %v516_v17, %v533_v26 }
 0x187   :  { %v904_v37 = vshrl.u32 %v903_v42, 23  ;;  %v665_v3 = vshrl.u32 %v647_v36, %v663_v27  ;;  %v668_v61 = vadd.s32 127, %v667_v28  ;;  %v531_v11 = vsel %vm521_vm0, %v528_v5, %v530_v34 }
 0x188   :  { %v535_v43 = vsel %vm521_vm0, %v532_v44, %v534_v54  ;;  %v1238_v9 = vpop.eup %1237  ;;  %v1759_v38 = vmul.u32.u64.low %v1734_v30, %v531_v11  ;;  %v1760_v40 = vmul.u32.u64.high %v1734_v30, %v531_v11, %v1759_v38  ;;  %vm274_vm2 = vcmp.eq.s32.totalorder %v1715_v46, 0 }
 0x189   :  { %v1755_v31 = vmul.u32.u64.low %v1734_v30, %v535_v43  ;;  %v1756_v4 = vmul.u32.u64.high %v1734_v30, %v535_v43, %v1755_v31  ;;  %v1240_v50 = vpop.eup %1239  ;;  %v278_v6 = vxor.u32 2147483648, %v1238_v9  ;;  %v666_v33 = vor.u32 %v665_v3, %v664_v10 }
 0x18a   :  { %v669_v41 = vshll.u32 %v668_v61, 23  ;;  %v1066_v49 = vadd.s32 4294967169, %v904_v37  ;;  %v275_v36 = vxor.u32 2147483648, %v1240_v50  ;;  %vm277_vm3 = vcmp.eq.s32.totalorder %v1715_v46, 2 }
 0x18b   :  { %v900_v22 = vand.u32 2147483647, %v1723_v47  ;;  %v279_v45 = vsel %vm277_vm3, %v278_v6, %v1240_v50  ;;  %v677_v24 = vsub.s32 4, %v1704_v23  ;;  %v543_v56 = vmul.u32 %v1734_v30, %v527_v29 }
 0x18c   :  { %v670_v58 = vor.u32 4788187, %v669_v41  ;;  %v910_v0 = vadd.s32 1, %v1066_v49  ;;  %v276_v13 = vsel %vm274_vm2, %v1238_v9, %v275_v36  ;;  %vm545_vm4 = vc.u32 %v1756_v4, %v1759_v38 }
 0x18d   :  { %v546_v7 = vadd.s32 1, %v1760_v40  ;;  %v280_v59 = vsel %vm273_vm14, %v276_v13, %v279_v45  ;;  %v673_v35 = vcvt.s32.f32 %v666_v33  ;;  %v907_v17 = vand.u32 8388607, %v900_v22 }
 0x18e   :  { %v671_v19 = vand.u32 2147483647, %v670_v58  ;;  %vm911_vm5 = vcmp.gt.s32.totalorder %v910_v0, 0  ;;  %v281_v55 = vsel %vm271_vm15, nan, %v280_v59  ;;  %v678_v5 = vsel %vm593_vm1, %v677_v24, %v1704_v23 }
 0x18f   :  { %v547_v63 = vsel %vm545_vm4, %v546_v7, %v1760_v40  ;;  %v912_v30 = vsel %vm911_vm5, %v910_v0, 0  ;;  %v1003_v48 = vmul.f32 0.25, %v281_v55  ;;  %vm1783_vm6 = vcmp.le.f32.partialorder %v591_v57, 0.7853982 }
 0x190   :  { %v674_v51 = vmul.f32 %v673_v35, %v671_v19  ;;  %v548_v46 = vadd.s32 %v547_v63, %v543_v56  ;;  %v914_v21 = vand.u32 31, %v912_v30  ;;  %v1789_v20 = vadd.f32 %v1398_v32, %v1422_v52 }
 0x191   :  { %1011 = vst [vmem:[#allocation7] sm:$0xff] %v1003_v48  ;;  %v680_v60 = vsel %vm1783_vm6, 0, %v678_v5  ;;  %v908_v1 = vor.u32 8388608, %v907_v17  ;;  %v913_v23 = vshrl.u32 %v912_v30, 5  ;;  %vm683_vm11 = vweird.f32 %v1428_v2 }
 0x192   :  { %v675_v44 = vxor.u32 2147483648, %v674_v51  ;;  %v549_v42 = vadd.s32 536870912, %v548_v46  ;;  %v915_v26 = vsub.s32 32, %v914_v21  ;;  %v917_v57 = vshll.u32 %v1338_v8, %v914_v21 }
 0x193   :  { %v920_v28 = vshll.u32 %v1339_v12, %v914_v21  ;;  %v923_v34 = vshll.u32 %v1340_v14, %v914_v21  ;;  %v926_v3 = vshll.u32 %v1341_v16, %v914_v21  ;;  %v929_v40 = vshll.u32 %v1342_v18, %v914_v21 }
 0x194   :  { %v676_v27 = vsel %vm593_vm1, %v675_v44, %v674_v51  ;;  %v1795_v10 = vshrl.u32 %v549_v42, 30  ;;  %v918_v52 = vshrl.u32 %v1339_v12, %v915_v26  ;;  %v921_v29 = vshrl.u32 %v1340_v14, %v915_v26 }
 0x195   :  { %v679_v32 = vsel %vm1783_vm6, %v1428_v2, %v676_v27  ;;  %v924_v37 = vshrl.u32 %v1341_v16, %v915_v26  ;;  %v927_v43 = vshrl.u32 %v1342_v18, %v915_v26  ;;  %v930_v50 = vshrl.u32 %v1343_v25, %v915_v26 }
 0x196   :  { %1241 = vcosq.f32 %v679_v32  ;;  %v551_v54 = vshll.u32 %v1795_v10, 30  ;;  %v919_v61 = vor.u32 %v918_v52, %v917_v57  ;;  %v922_v11 = vor.u32 %v921_v29, %v920_v28 }
 0x197   :  { %1243 = vsinq.f32 %v679_v32  ;;  %v925_v31 = vor.u32 %v924_v37, %v923_v34  ;;  %v684_v6 = vand.u32 3, %v680_v60  ;;  %v928_v33 = vor.u32 %v927_v43, %v926_v3 }
 0x198   :  { %v1809_v9 = vsub.s32 %v548_v46, %v551_v54  ;;  %v948_v41 = vshll.u32 %v908_v1, 8  ;;  %v388_v49 = vand.u32 2139095040, %v1789_v20  ;;  %v931_v45 = vor.u32 %v930_v50, %v929_v40 }
 0x199   :  { %vm932_vm7 = vcmp.lt.s32.totalorder %v913_v23, 1  ;;  %vm935_vm8 = vcmp.lt.s32.totalorder %v913_v23, 4  ;;  %v916_v58 = vshrl.u32 %v1338_v8, %v915_v26  ;;  %vm933_vm9 = vcmp.lt.s32.totalorder %v913_v23, 2 }
 0x19a   :  { %v554_v36 = vsub.s32 0, %v1809_v9  ;;  %v937_v24 = vsel %vm935_vm8, %v925_v31, 2102212464  ;;  %v940_v0 = vsel %vm932_vm7, %v919_v61, %v922_v11  ;;  %v941_v13 = vsel %vm935_vm8, %v928_v33, 920167782 }
 0x19b   :  { %vm934_vm10 = vcmp.lt.s32.totalorder %v913_v23, 3  ;;  %v944_v7 = vsel %vm932_vm7, %v922_v11, %v925_v31  ;;  %v936_v59 = vsel %vm932_vm7, %v916_v58, %v919_v61  ;;  %v945_v35 = vsel %vm935_vm8, %v931_v45, 1326507024 }
 0x19c   :  { %v1051_v56 = vmin.u32 %v554_v36, %v1809_v9  ;;  %v942_v19 = vsel %vm934_vm10, %v925_v31, %v941_v13  ;;  %v389_v55 = vshrl.u32 %v388_v49, 23  ;;  %v938_v17 = vsel %vm934_vm10, %v922_v11, %v937_v24 }
 0x19d   :  { %v943_v30 = vsel %vm933_vm9, %v940_v0, %v942_v19  ;;  %v946_v48 = vsel %vm934_vm10, %v928_v33, %v945_v35  ;;  %vm685_vm12 = vcmp.lt.s32.totalorder %v684_v6, 2  ;;  %vm686_vm13 = vcmp.eq.s32.totalorder %v684_v6, 0 }
 0x19e   :  { %v556_v63 = vclz %v1051_v56  ;;  %v947_v51 = vsel %vm933_vm9, %v944_v7, %v946_v48  ;;  %v1820_v5 = vmul.u32.u64.low %v948_v41, %v943_v30  ;;  %v1821_v46 = vmul.u32.u64.high %v948_v41, %v943_v30, %v1820_v5 }
 0x19f   :  { %v1824_v44 = vmul.u32.u64.low %v948_v41, %v947_v51  ;;  %v1825_v42 = vmul.u32.u64.high %v948_v41, %v947_v51, %v1824_v44  ;;  %v1046_v60 = vadd.s32 4294967169, %v389_v55  ;;  %vm689_vm14 = vcmp.eq.s32.totalorder %v684_v6, 2 }
 0x1a0   :  { %v1242_v21 = vpop.eup %1241  ;;  %v1052_v39 = vadd.s32 4294967294, %v556_v63  ;;  %v939_v27 = vsel %vm933_vm9, %v936_v59, %v938_v17  ;;  %v385_v28 = vand.u32 2147483647, %v1789_v20  ;;  %v544_v29 = vadd.s32 %v1759_v38, %v1756_v4  ;;  %v1261_v59 = vld [vmem:[%s1989_s2] ss:$0 sm:$0xff]  ;;  %s1344_s2 = smov [#allocation7]  }
 0x1a1   :  { %v1244_v1 = vpop.eup %1243  ;;  %v690_v26 = vxor.u32 2147483648, %v1242_v21  ;;  %v395_v32 = vadd.s32 1, %v1046_v60  ;;  %v958_v54 = vadd.s32 1, %v1821_v46  ;;  %v955_v11 = vmul.u32 %v948_v41, %v939_v27  ;;  %s1024_s13 = sshll.u32 %s1344_s2, 4  ;;  %s1025_s13 = int_to_ptr.vmem [resolvable:$true] %s1024_s13 }
 0x1a2   :  { %v687_v57 = vxor.u32 2147483648, %v1244_v1  ;;  %vm1053_vm15 = vcmp.lt.s32.totalorder %v1052_v39, 0  ;;  %vm957_vm0 = vc.u32 %v1825_v42, %v1820_v5  ;;  %v392_v41 = vand.u32 8388607, %v385_v28  ;;  %s1306_s14 = scalar_lea.vmem %s1025_s13, 1024  ;;  %p1311_p3 = scmp.lt.s32.totalorder %s1025_s13, %s1025_s13 }
 0x1a3   :  { %v691_v52 = vsel %vm689_vm14, %v690_v26, %v1244_v1  ;;  %v559_v34 = vsel %vm1053_vm15, 0, %v1052_v39  ;;  %vm396_vm1 = vcmp.gt.s32.totalorder %v395_v32, 0  ;;  %v959_v38 = vsel %vm957_vm0, %v958_v54, %v1821_v46  ;;  %p1307_p2 = scmp.ne.s32.totalorder %s1025_s13, %s1306_s14  ;;  %p1312_p4 = scmp.lt.s32.totalorder %s1306_s14, %s1306_s14 }
 0x1a4   :  { %v688_v37 = vsel %vm686_vm13, %v1242_v21, %v687_v57  ;;  %v560_v3 = vsub.s32 32, %v559_v34  ;;  %v564_v61 = vsub.s32 4294967266, %v559_v34  ;;  %v561_v23 = vshll.u32 %v1809_v9, %v559_v34 }
 0x1a5   :  { %v692_v43 = vsel %vm685_vm12, %v688_v37, %v691_v52  ;;  %v960_v33 = vadd.s32 %v959_v38, %v955_v11  ;;  %v397_v6 = vsel %vm396_vm1, %v395_v32, 0  ;;  %vm490_vm2 = vcmp.lt.s32.totalorder %v1647_v62, 0  ;;  %p1313_p5 = por %p1312_p4, %p1311_p3 }
 0x1a6   :  { %v693_v31 = vsel %vm683_vm11, nan, %v692_v43  ;;  %v562_v40 = vshrl.u32 %v544_v29, %v560_v3  ;;  %v565_v4 = vadd.s32 127, %v564_v61  ;;  %v399_v9 = vand.u32 31, %v397_v6 }
 0x1a7   :  { %v1007_v50 = vmul.f32 0.25, %v693_v31  ;;  %v961_v45 = vadd.s32 536870912, %v960_v33  ;;  %vm1844_vm3 = vcmp.le.f32.partialorder %v488_v15, 0.7853982  ;;  %v574_v24 = vsub.s32 4, %v1795_v10  ;;  %p1314_p6 = pnand %p1313_p5, %p1307_p2 }
 0x1a8   :  { %v563_v49 = vor.u32 %v562_v40, %v561_v23  ;;  %v566_v36 = vshll.u32 %v565_v4, 23  ;;  %v400_v0 = vsub.s32 32, %v399_v9  ;;  %v393_v7 = vor.u32 8388608, %v392_v41 }
 0x1a9   :  { %1015 = vst [vmem:[#allocation7 + $0x20] sm:$0xff] %v1007_v50  ;;  %v1849_v56 = vshrl.u32 %v961_v45, 30  ;;  %v1855_v19 = vadd.f32 %v1261_v59, %v1424_v53  ;;  %v402_v15 = vshll.u32 %v1338_v8, %v399_v9  ;;  %v405_v30 = vshll.u32 %v1339_v12, %v399_v9 }
 0x1aa   :  { %v567_v58 = vor.u32 4788187, %v566_v36  ;;  %v570_v13 = vcvt.s32.f32 %v563_v49  ;;  %v403_v55 = vshrl.u32 %v1339_v12, %v400_v0  ;;  %v406_v63 = vshrl.u32 %v1340_v14, %v400_v0 }
 0x1ab   :  { %v963_v17 = vshll.u32 %v1849_v56, 30  ;;  %v409_v48 = vshrl.u32 %v1341_v16, %v400_v0  ;;  %v412_v51 = vshrl.u32 %v1342_v18, %v400_v0  ;;  %v575_v53 = vsel %vm490_vm2, %v574_v24, %v1795_v10 }
 0x1ac   :  { %v568_v35 = vand.u32 2147483647, %v567_v58  ;;  %v398_v21 = vshrl.u32 %v397_v6, 5  ;;  %v408_v39 = vshll.u32 %v1340_v14, %v399_v9  ;;  %v404_v60 = vor.u32 %v403_v55, %v402_v15 }
 0x1ad   :  { %v1868_v44 = vsub.s32 %v960_v33, %v963_v17  ;;  %v407_v1 = vor.u32 %v406_v63, %v405_v30  ;;  %v411_v26 = vshll.u32 %v1341_v16, %v399_v9  ;;  %v414_v32 = vshll.u32 %v1342_v18, %v399_v9 }
 0x1ae   :  { %v571_v46 = vmul.f32 %v570_v13, %v568_v35  ;;  %v410_v57 = vor.u32 %v409_v48, %v408_v39  ;;  %v415_v52 = vshrl.u32 %v1343_v25, %v400_v0  ;;  %v433_v54 = vshll.u32 %v393_v7, 8 }
 0x1af   :  { %v966_v29 = vsub.s32 0, %v1868_v44  ;;  %v413_v34 = vor.u32 %v412_v51, %v411_v26  ;;  %v800_v10 = vand.u32 2139095040, %v1855_v19  ;;  %v401_v3 = vshrl.u32 %v1338_v8, %v400_v0 }
 0x1b0   :  { %v572_v27 = vxor.u32 2147483648, %v571_v46  ;;  %v416_v61 = vor.u32 %v415_v52, %v414_v32  ;;  %vm417_vm4 = vcmp.lt.s32.totalorder %v398_v21, 1  ;;  %vm419_vm5 = vcmp.lt.s32.totalorder %v398_v21, 3 }
 0x1b1   :  { %v1067_v43 = vmin.u32 %v966_v29, %v1868_v44  ;;  %vm420_vm6 = vcmp.lt.s32.totalorder %v398_v21, 4  ;;  %v421_v23 = vsel %vm417_vm4, %v401_v3, %v404_v60  ;;  %v425_v40 = vsel %vm417_vm4, %v404_v60, %v407_v1 }
 0x1b2   :  { %v573_v37 = vsel %vm490_vm2, %v572_v27, %v571_v46  ;;  %v422_v31 = vsel %vm420_vm6, %v410_v57, 2102212464  ;;  %v426_v50 = vsel %vm420_vm6, %v413_v34, 920167782  ;;  %vm418_vm7 = vcmp.lt.s32.totalorder %v398_v21, 2 }
 0x1b3   :  { %v576_v11 = vsel %vm1844_vm3, %v1647_v62, %v573_v37  ;;  %v968_v4 = vclz %v1067_v43  ;;  %v423_v38 = vsel %vm419_vm5, %v407_v1, %v422_v31  ;;  %v427_v33 = vsel %vm419_vm5, %v410_v57, %v426_v50 }
 0x1b4   :  { %1245 = vcosq.f32 %v576_v11  ;;  %v429_v41 = vsel %vm417_vm4, %v407_v1, %v410_v57  ;;  %v430_v6 = vsel %vm420_vm6, %v416_v61, 1326507024  ;;  %v577_v49 = vsel %vm1844_vm3, 0, %v575_v53 }
 0x1b5   :  { %1247 = vsinq.f32 %v576_v11  ;;  %v1068_v36 = vadd.s32 4294967294, %v968_v4  ;;  %v428_v9 = vsel %vm418_vm7, %v425_v40, %v427_v33  ;;  %v431_v45 = vsel %vm419_vm5, %v413_v34, %v430_v6 }
 0x1b6   :  { %v424_v58 = vsel %vm418_vm7, %v421_v23, %v423_v38  ;;  %v432_v24 = vsel %vm418_vm7, %v429_v41, %v431_v45  ;;  %v1887_v0 = vmul.u32.u64.low %v433_v54, %v428_v9  ;;  %v1888_v13 = vmul.u32.u64.high %v433_v54, %v428_v9, %v1887_v0 }
 0x1b7   :  { %vm1069_vm8 = vcmp.lt.s32.totalorder %v1068_v36, 0  ;;  %v1891_v7 = vmul.u32.u64.low %v433_v54, %v432_v24  ;;  %v1892_v59 = vmul.u32.u64.high %v433_v54, %v432_v24, %v1891_v7  ;;  %v801_v35 = vshrl.u32 %v800_v10, 23 }
 0x1b8   :  { %v971_v15 = vsel %vm1069_vm8, 0, %v1068_v36  ;;  %v956_v2 = vadd.s32 %v1820_v5, %v1825_v42  ;;  %vm580_vm9 = vweird.f32 %v1647_v62  ;;  %v581_v30 = vand.u32 3, %v577_v49 }
 0x1b9   :  { %v972_v55 = vsub.s32 32, %v971_v15  ;;  %v976_v63 = vsub.s32 4294967266, %v971_v15  ;;  %v1062_v17 = vadd.s32 4294967169, %v801_v35  ;;  %v440_v48 = vmul.u32 %v433_v54, %v424_v58 }
 0x1ba   :  { %v443_v51 = vadd.s32 1, %v1888_v13  ;;  %v973_v46 = vshll.u32 %v1868_v44, %v971_v15  ;;  %vm442_vm10 = vc.u32 %v1892_v59, %v1887_v0  ;;  %vm902_vm11 = vcmp.lt.s32.totalorder %v1723_v47, 0 }
 0x1bb   :  { %v974_v53 = vshrl.u32 %v956_v2, %v972_v55  ;;  %v977_v21 = vadd.s32 127, %v976_v63  ;;  %v797_v42 = vand.u32 2147483647, %v1855_v19  ;;  %v807_v60 = vadd.s32 1, %v1062_v17 }
 0x1bc   :  { %v444_v5 = vsel %vm442_vm10, %v443_v51, %v1888_v13  ;;  %vm586_vm12 = vcmp.eq.s32.totalorder %v581_v30, 2  ;;  %v986_v44 = vsub.s32 4, %v1849_v56  ;;  %vm583_vm14 = vcmp.eq.s32.totalorder %v581_v30, 0 }
 0x1bd   :  { %v975_v27 = vor.u32 %v974_v53, %v973_v46  ;;  %v978_v57 = vshll.u32 %v977_v21, 23  ;;  %v445_v32 = vadd.s32 %v444_v5, %v440_v48  ;;  %vm808_vm13 = vcmp.gt.s32.totalorder %v807_v60, 0 }
 0x1be   :  { %v1246_v39 = vpop.eup %1245  ;;  %vm582_vm15 = vcmp.lt.s32.totalorder %v581_v30, 2  ;;  %v804_v37 = vand.u32 8388607, %v797_v42  ;;  %v809_v3 = vsel %vm808_vm13, %v807_v60, 0  ;;  %v987_v40 = vsel %vm902_vm11, %v986_v44, %v1849_v56 }
 0x1bf   :  { %v1248_v1 = vpop.eup %1247  ;;  %v587_v26 = vxor.u32 2147483648, %v1246_v39  ;;  %v979_v34 = vor.u32 4788187, %v978_v57  ;;  %v446_v54 = vadd.s32 536870912, %v445_v32  ;;  %v982_v43 = vcvt.s32.f32 %v975_v27 }
 0x1c0   :  { %v584_v52 = vxor.u32 2147483648, %v1248_v1  ;;  %v811_v4 = vand.u32 31, %v809_v3  ;;  %vm1917_vm0 = vcmp.le.f32.partialorder %v900_v22, 0.7853982  ;;  %v805_v56 = vor.u32 8388608, %v804_v37 }
 0x1c1   :  { %v588_v29 = vsel %vm586_vm12, %v587_v26, %v1248_v1  ;;  %v980_v11 = vand.u32 2147483647, %v979_v34  ;;  %v1907_v23 = vshrl.u32 %v446_v54, 30  ;;  %v989_v62 = vsel %vm1917_vm0, 0, %v987_v40 }
 0x1c2   :  { %v585_v10 = vsel %vm583_vm14, %v1246_v39, %v584_v52  ;;  %v812_v6 = vsub.s32 32, %v811_v4  ;;  %v810_v9 = vshrl.u32 %v809_v3, 5  ;;  %v814_v45 = vshll.u32 %v1338_v8, %v811_v4 }
 0x1c3   :  { %v589_v61 = vsel %vm582_vm15, %v585_v10, %v588_v29  ;;  %v983_v50 = vmul.f32 %v982_v43, %v980_v11  ;;  %v448_v33 = vshll.u32 %v1907_v23, 30  ;;  %v817_v7 = vshll.u32 %v1339_v12, %v811_v4 }
 0x1c4   :  { %v590_v31 = vsel %vm580_vm9, nan, %v589_v61  ;;  %v815_v58 = vshrl.u32 %v1339_v12, %v812_v6  ;;  %v818_v24 = vshrl.u32 %v1340_v14, %v812_v6  ;;  %v821_v35 = vshrl.u32 %v1341_v16, %v812_v6 }
 0x1c5   :  { %v1006_v38 = vmul.f32 0.25, %v590_v31  ;;  %v984_v49 = vxor.u32 2147483648, %v983_v50  ;;  %v1923_v36 = vsub.s32 %v445_v32, %v448_v33  ;;  %v820_v2 = vshll.u32 %v1340_v14, %v811_v4 }
 0x1c6   :  { %v823_v55 = vshll.u32 %v1341_v16, %v811_v4  ;;  %v824_v63 = vshrl.u32 %v1342_v18, %v812_v6  ;;  %v816_v30 = vor.u32 %v815_v58, %v814_v45  ;;  %v819_v48 = vor.u32 %v818_v24, %v817_v7 }
 0x1c7   :  { %1014 = vst [vmem:[#allocation7 + $0x18] sm:$0xff] %v1006_v38  ;;  %v985_v22 = vsel %vm902_vm11, %v984_v49, %v983_v50  ;;  %v451_v13 = vsub.s32 0, %v1923_v36  ;;  %v822_v51 = vor.u32 %v821_v35, %v820_v2  ;;  %v993_v46 = vand.u32 3, %v989_v62 }
 0x1c8   :  { %v988_v15 = vsel %vm1917_vm0, %v1723_v47, %v985_v22  ;;  %v825_v12 = vor.u32 %v824_v63, %v823_v55  ;;  %v826_v21 = vshll.u32 %v1342_v18, %v811_v4  ;;  %v827_v39 = vshrl.u32 %v1343_v25, %v812_v6 }
 0x1c9   :  { %1249 = vcosq.f32 %v988_v15  ;;  %v1047_v17 = vmin.u32 %v451_v13, %v1923_v36  ;;  %v441_v14 = vadd.s32 %v1887_v0, %v1892_v59  ;;  %v813_v16 = vshrl.u32 %v1338_v8, %v812_v6 }
 0x1ca   :  { %1251 = vsinq.f32 %v988_v15  ;;  %vm829_vm1 = vcmp.lt.s32.totalorder %v810_v9, 1  ;;  %v845_v5 = vshll.u32 %v805_v56, 8  ;;  %v828_v1 = vor.u32 %v827_v39, %v826_v21 }
 0x1cb   :  { %v453_v53 = vclz %v1047_v17  ;;  %vm832_vm2 = vcmp.lt.s32.totalorder %v810_v9, 4  ;;  %v837_v26 = vsel %vm829_vm1, %v816_v30, %v819_v48  ;;  %vm831_vm3 = vcmp.lt.s32.totalorder %v810_v9, 3 }
 0x1cc   :  { %v834_v27 = vsel %vm832_vm2, %v822_v51, 2102212464  ;;  %v838_v57 = vsel %vm832_vm2, %v825_v12, 920167782  ;;  %v841_v32 = vsel %vm829_vm1, %v819_v48, %v822_v51  ;;  %vm830_vm5 = vcmp.lt.s32.totalorder %v810_v9, 2 }
 0x1cd   :  { %v1048_v60 = vadd.s32 4294967294, %v453_v53  ;;  %v839_v18 = vsel %vm831_vm3, %v822_v51, %v838_v57  ;;  %v842_v52 = vsel %vm832_vm2, %v828_v1, 1326507024  ;;  %v833_v44 = vsel %vm829_vm1, %v813_v16, %v816_v30 }
 0x1ce   :  { %v840_v0 = vsel %vm830_vm5, %v837_v26, %v839_v18  ;;  %v843_v59 = vsel %vm831_vm3, %v825_v12, %v842_v52  ;;  %v835_v34 = vsel %vm831_vm3, %v819_v48, %v834_v27  ;;  %vm998_vm6 = vcmp.eq.s32.totalorder %v993_v46, 2 }
 0x1cf   :  { %vm1049_vm4 = vcmp.lt.s32.totalorder %v1048_v60, 0  ;;  %v844_v54 = vsel %vm830_vm5, %v841_v32, %v843_v59  ;;  %v1950_v3 = vmul.u32.u64.low %v845_v5, %v840_v0  ;;  %v1951_v61 = vmul.u32.u64.high %v845_v5, %v840_v0, %v1950_v3 }
 0x1d0   :  { %v456_v25 = vsel %vm1049_vm4, 0, %v1048_v60  ;;  %v1947_v10 = vmul.u32.u64.low %v845_v5, %v844_v54  ;;  %v1948_v37 = vmul.u32.u64.high %v845_v5, %v844_v54, %v1947_v10  ;;  %v836_v50 = vsel %vm830_vm5, %v833_v44, %v835_v34 }
 0x1d1   :  { %v457_v8 = vsub.s32 32, %v456_v25  ;;  %v461_v29 = vsub.s32 4294967266, %v456_v25  ;;  %v458_v43 = vshll.u32 %v1923_v36, %v456_v25  ;;  %vm995_vm7 = vcmp.eq.s32.totalorder %v993_v46, 0 }
 0x1d2   :  { %vm854_vm8 = vc.u32 %v1948_v37, %v1950_v3  ;;  %v855_v62 = vadd.s32 1, %v1951_v61  ;;  %vm994_vm9 = vcmp.lt.s32.totalorder %v993_v46, 2  ;;  %v852_v36 = vmul.u32 %v845_v5, %v836_v50 }
 0x1d3   :  { %v1250_v11 = vpop.eup %1249  ;;  %v459_v31 = vshrl.u32 %v441_v14, %v457_v8  ;;  %v462_v40 = vadd.s32 127, %v461_v29  ;;  %vm992_vm10 = vweird.f32 %v1723_v47  ;;  %vm387_vm11 = vcmp.lt.s32.totalorder %v1789_v20, 0 }
 0x1d4   :  { %v1252_v4 = vpop.eup %1251  ;;  %v999_v38 = vxor.u32 2147483648, %v1250_v11  ;;  %v856_v9 = vsel %vm854_vm8, %v855_v62, %v1951_v61  ;;  %v471_v17 = vsub.s32 4, %v1907_v23  ;;  %vm386_vm12 = vcmp.le.f32.partialorder %v385_v28, 0.7853982 }
 0x1d5   :  { %v996_v33 = vxor.u32 2147483648, %v1252_v4  ;;  %v460_v41 = vor.u32 %v459_v31, %v458_v43  ;;  %v463_v6 = vshll.u32 %v462_v40, 23  ;;  %v857_v7 = vadd.s32 %v856_v9, %v852_v36 }
 0x1d6   :  { %v1000_v49 = vsel %vm998_vm6, %v999_v38, %v1252_v4  ;;  %v472_v12 = vsel %vm387_vm11, %v471_v17, %v1907_v23  ;;  %v853_v27 = vadd.s32 %v1950_v3, %v1948_v37  ;;  %vm477_vm1 = vweird.f32 %v1789_v20 }
 0x1d7   :  { %v997_v56 = vsel %vm995_vm7, %v1250_v11, %v996_v33  ;;  %v464_v45 = vor.u32 4788187, %v463_v6  ;;  %v467_v13 = vcvt.s32.f32 %v460_v41  ;;  %v858_v2 = vadd.s32 536870912, %v857_v7 }
 0x1d8   :  { %v1001_v58 = vsel %vm994_vm9, %v997_v56, %v1000_v49  ;;  %v474_v53 = vsel %vm386_vm12, 0, %v472_v12  ;;  %vm799_vm2 = vcmp.lt.s32.totalorder %v1855_v19, 0  ;;  %vm798_vm3 = vcmp.le.f32.partialorder %v797_v42, 0.7853982 }
 0x1d9   :  { %v1002_v24 = vsel %vm992_vm10, nan, %v1001_v58  ;;  %v465_v22 = vand.u32 2147483647, %v464_v45  ;;  %v859_v63 = vshrl.u32 %v858_v2, 30  ;;  %v478_v14 = vand.u32 3, %v474_v53 }
 0x1da   :  { %v1010_v35 = vmul.f32 0.25, %v1002_v24  ;;  %vm889_vm7 = vweird.f32 %v1855_v19 }
 0x1db   :  { %v468_v15 = vmul.f32 %v467_v13, %v465_v22  ;;  %v860_v30 = vshll.u32 %v859_v63, 30  ;;  %vm483_vm14 = vcmp.eq.s32.totalorder %v478_v14, 2  ;;  %vm479_vm15 = vcmp.lt.s32.totalorder %v478_v14, 2 }
 0x1dc   :  { %1018 = vst [vmem:[#allocation7 + $0x38] sm:$0xff] %v1010_v35  ;;  %vm480_vm0 = vcmp.eq.s32.totalorder %v478_v14, 0  ;;  %v883_v43 = vsub.s32 4, %v859_v63 }
 0x1dd   :  { %v469_v55 = vxor.u32 2147483648, %v468_v15  ;;  %v861_v51 = vsub.s32 %v857_v7, %v860_v30 }
 0x1de   :  { %v884_v31 = vsel %vm799_vm2, %v883_v43, %v859_v63 }
 0x1df   :  { %v470_v47 = vsel %vm387_vm11, %v469_v55, %v468_v15  ;;  %v863_v46 = vsub.s32 0, %v861_v51  ;;  %v886_v40 = vsel %vm798_vm3, 0, %v884_v31 }
 0x1e0   :  { %v473_v48 = vsel %vm386_vm12, %v1789_v20, %v470_v47  ;;  %v890_v4 = vand.u32 3, %v886_v40 }
 0x1e1   :  { %1253 = vcosq.f32 %v473_v48  ;;  %v1063_v21 = vmin.u32 %v863_v46, %v861_v51 }
 0x1e2   :  { %1255 = vsinq.f32 %v473_v48  ;;  %vm895_vm4 = vcmp.eq.s32.totalorder %v890_v4, 2  ;;  %vm892_vm5 = vcmp.eq.s32.totalorder %v890_v4, 0  ;;  %vm891_vm6 = vcmp.lt.s32.totalorder %v890_v4, 2 }
 0x1e3   :  { %v865_v39 = vclz %v1063_v21 }
 0x1e5   :  { %v1064_v16 = vadd.s32 4294967294, %v865_v39 }
 0x1e7   :  { %vm1065_vm13 = vcmp.lt.s32.totalorder %v1064_v16, 0 }
 0x1e8   :  { %v868_v1 = vsel %vm1065_vm13, 0, %v1064_v16 }
 0x1e9   :  { %v869_v57 = vsub.s32 32, %v868_v1  ;;  %v873_v32 = vsub.s32 4294967266, %v868_v1  ;;  %v870_v52 = vshll.u32 %v861_v51, %v868_v1 }
 0x1eb   :  { %v1254_v5 = vpop.eup %1253  ;;  %v871_v25 = vshrl.u32 %v853_v27, %v869_v57  ;;  %v874_v44 = vadd.s32 127, %v873_v32 }
 0x1ec   :  { %v1256_v60 = vpop.eup %1255  ;;  %v484_v28 = vxor.u32 2147483648, %v1254_v5 }
 0x1ed   :  { %v481_v26 = vxor.u32 2147483648, %v1256_v60  ;;  %v872_v8 = vor.u32 %v871_v25, %v870_v52  ;;  %v875_v29 = vshll.u32 %v874_v44, 23 }
 0x1ee   :  { %v485_v23 = vsel %vm483_vm14, %v484_v28, %v1256_v60 }
 0x1ef   :  { %v482_v18 = vsel %vm480_vm0, %v1254_v5, %v481_v26  ;;  %v876_v54 = vor.u32 4788187, %v875_v29  ;;  %v879_v37 = vcvt.s32.f32 %v872_v8 }
 0x1f0   :  { %v486_v0 = vsel %vm479_vm15, %v482_v18, %v485_v23 }
 0x1f1   :  { %v487_v59 = vsel %vm477_vm1, nan, %v486_v0  ;;  %v877_v10 = vand.u32 2147483647, %v876_v54 }
 0x1f2   :  { %v1005_v34 = vmul.f32 0.25, %v487_v59 }
 0x1f3   :  { %v880_v3 = vmul.f32 %v879_v37, %v877_v10 }
 0x1f4   :  { %1013 = vst [vmem:[#allocation7 + $0x10] sm:$0xff] %v1005_v34 }
 0x1f5   :  { %v881_v61 = vxor.u32 2147483648, %v880_v3 }
 0x1f7   :  { %v882_v11 = vsel %vm799_vm2, %v881_v61, %v880_v3 }
 0x1f8   :  { %v885_v20 = vsel %vm798_vm3, %v1855_v19, %v882_v11 }
 0x1f9   :  { %1257 = vcosq.f32 %v885_v20 }
 0x1fa   :  { %1259 = vsinq.f32 %v885_v20 }
 0x203   :  { %v1258_v38 = vpop.eup %1257 }
 0x204   :  { %v1260_v50 = vpop.eup %1259  ;;  %v896_v33 = vxor.u32 2147483648, %v1258_v38 }
 0x205   :  { %v893_v41 = vxor.u32 2147483648, %v1260_v50 }
 0x206   :  { %v897_v6 = vsel %vm895_vm4, %v896_v33, %v1260_v50 }
 0x207   :  { %v894_v49 = vsel %vm892_vm5, %v1258_v38, %v893_v41 }
 0x208   :  { %v898_v42 = vsel %vm891_vm6, %v894_v49, %v897_v6 }
 0x209   :  { %v899_v62 = vsel %vm889_vm7, nan, %v898_v42 }
 0x20a   :  { %v1009_v56 = vmul.f32 0.25, %v899_v62 }
 0x20c   :  { %1017 = vst [vmem:[#allocation7 + $0x30] sm:$0xff] %v1009_v56 }
 0x20d   :  { %1317 = shalt.err (!%p1314_p6)
}
 0x20e   :  { %s1318_s17 = scalar_lea.hbm %s1990_s3, 1024 }
 0x20f   :  { %p1319_p7 = scmp.ne.s32.totalorder %s1990_s3, %s1318_s17  ;;  %p1322_p8 = scmp.lt.u32.totalorder %s1318_s17, %s1990_s3 }
 0x211   :  { %p1324_p9 = pnand %p1322_p8, %p1319_p7 }
 0x213   :  { %1327 = shalt.err (!%p1324_p9)
}
 0x214   :  { %1030 = dma.vmem_to_hbm [thread:$0]  %s1025_s13, 1024, %s1990_s3, [#allocation4], %s1335_s22, %s1335_s22, %s1336_s23  }
 0x215   :  { %1332 = dma.done.wait [#allocation4], 1024  }
 0x216   :  { %1333 = vsyncadd [#allocation4], 4294966272 }
 0x217   :  { %1034 = vsyncpa [#allocation3], 1 }
 0x218   :  { %1035 = vsyncpa [#allocation6], 1 }
 0x219   :  { %1036 = vsyncpa [#allocation4], 1 }

</bundles_post_ra>
